<compile_context>
chip_gen: v7x
topology: tpu7x:2x2x1
jax: 0.10.0
libtpu: 0.0.40
codegen_flags: <defaults>
</compile_context>

<pallas_src>
import functools

import jax
import jax.numpy as jnp
from jax import lax
from jax.experimental import pallas as pl
from jax.experimental.pallas import tpu as pltpu


_BN_EPS = 1e-5
_VMEM_LIMIT = 48 * 1024 * 1024      # leaves headroom vs v7x's 64 MiB physical VMEM
_PASS2_MAX_ROWS = 8192              # fused pass-2 tile cap (rows of the Ho*Wo axis)


def _round_up(x, m):
    return (x + m - 1) // m * m


# -----------------------------------------------------------------------------
# Pass 1: conv-as-matmul (MXU, f32 accumulation) + per-tile partial BN stats.
# -----------------------------------------------------------------------------
def _conv_stats_kernel(patches_ref, w_ref, y_ref, sum_ref, sq_ref):
    """patches: [tm, Kp] bf16, w: [Kp, Cp] bf16 (grid-resident),
    y: [tm, Cp] bf16 (downcast of the f32 accumulator),
    sum/sq: [1, 1, Cp] f32 per-tile partials (combined globally in the wrapper;
    zero-padded rows/channels contribute zero)."""
    acc = jnp.dot(patches_ref[...], w_ref[...], preferred_element_type=jnp.float32)
    y_ref[...] = acc.astype(y_ref.dtype)
    cp = acc.shape[-1]
    sum_ref[...] = jnp.sum(acc, axis=0, keepdims=True).reshape(1, 1, cp)
    sq_ref[...] = jnp.sum(acc * acc, axis=0, keepdims=True).reshape(1, 1, cp)


# -----------------------------------------------------------------------------
# Pass 2 (fused): normalize + crop to Cout + transpose to channel-major output.
# -----------------------------------------------------------------------------
def _bn_transpose_kernel(y_ref, scale_ref, shift_ref, out_ref):
    """y: [tm2, Cp] bf16, scale/shift: [1, Cp] f32, out: [1, Cout, tm2] f32."""
    ynorm = y_ref[...].astype(jnp.float32) * scale_ref[...] + shift_ref[...]
    yt = jnp.transpose(ynorm)                      # [Cp, tm2] on the XLU
    cout = out_ref.shape[1]
    out_ref[...] = yt[:cout, :].reshape(out_ref.shape).astype(out_ref.dtype)


# -----------------------------------------------------------------------------
# Pass 2 (fallback): plain lane-dense normalize; XLA does the crop + transpose.
# -----------------------------------------------------------------------------
def _bn_apply_kernel(y_ref, scale_ref, shift_ref, out_ref):
    out_ref[...] = (y_ref[...].astype(jnp.float32) * scale_ref[...]
                    + shift_ref[...]).astype(out_ref.dtype)


def _im2col_nhwc(x_nhwc, k, stride, pad):
    """Unfold NHWC input into [N*Ho*Wo, k*k*Cin] patches (kh-major, kw, then c)."""
    n, h, w, c = x_nhwc.shape
    xp = jnp.pad(x_nhwc, ((0, 0), (pad, pad), (pad, pad), (0, 0)))
    ho = (h + 2 * pad - k) // stride + 1
    wo = (w + 2 * pad - k) // stride + 1
    taps = []
    for kh in range(k):
        for kw in range(k):
            taps.append(
                xp[:, kh:kh + stride * ho:stride, kw:kw + stride * wo:stride, :]
            )
    p = jnp.stack(taps, axis=3)              # [N, Ho, Wo, k*k, C]
    return p.reshape(n * ho * wo, k * k * c), ho, wo


def _pick_pass2_ty(ho, wo, max_rows):
    """Largest ty | Ho whose fused tile (ty*Wo rows) is legal and lane-dense:
    last output-block dim a multiple of 128 (or the full Ho*Wo), sublane-clean
    (multiple of 16) for the bf16 y read, and within the row budget.
    Returns None -> caller uses the generic fallback path."""
    best = None
    for ty in range(1, ho + 1):
        if ho % ty:
            continue
        tm2 = ty * wo
        if tm2 > max_rows:
            break
        if tm2 % 16 == 0 and (tm2 % 128 == 0 or tm2 == ho * wo):
            best = ty
    return best


@functools.partial(jax.jit, static_argnames=("block_m",))
def start_conv_7x7(x_nchw, weight_oihw, gamma, beta, *, block_m=4096):
    """Forward of _StartConv(mode='7x7'): 7x7 s2 p3 conv (no bias) + BatchNorm2d."""
    n, cin, h, w = x_nchw.shape
    cout = weight_oihw.shape[0]
    k, stride, pad = 7, 2, 3

    # ---- layout glue (bf16 halves the materialized patch bytes in HBM) -------
    # TODO(synk): replace the XLA-materialized im2col with in-kernel patch
    # construction (see header note) to remove ~2/3 of pass-1 HBM traffic.
    x_nhwc = jnp.transpose(x_nchw, (0, 2, 3, 1)).astype(jnp.bfloat16)
    patches, ho, wo = _im2col_nhwc(x_nhwc, k, stride, pad)        # [M, K] bf16
    m_rows, k_dim = patches.shape

    # MXU/lane-friendly padding: K -> multiple of 128, Cout -> multiple of 128.
    k_pad = _round_up(k_dim, 128)
    c_pad = _round_up(cout, 128)

    # Pass-1 M tile: large (amortize per-step overhead), multiple of 16 (bf16
    # sublane tile), and >=2 tiles when possible so the "parallel" M axis can
    # split across both v7x TensorCores.
    tm = min(block_m, _round_up(m_rows, 16))
    if _round_up(m_rows, tm) // tm < 2 and m_rows > 16:
        tm = _round_up(-(-m_rows // 2), 16)
    m_pad = _round_up(m_rows, tm)
    n_tiles = m_pad // tm

    # Zero padding is statistics-neutral: padded rows/channels add 0 to sums.
    patches = jnp.pad(patches, ((0, m_pad - m_rows), (0, k_pad - k_dim)))

    # [Cout, Cin, kh, kw] -> [kh, kw, Cin, Cout] -> [K, Cout]  (matches patch order)
    w_mat = jnp.transpose(weight_oihw, (2, 3, 1, 0)).reshape(k_dim, cout)
    w_mat = jnp.pad(w_mat, ((0, k_pad - k_dim), (0, c_pad - cout))).astype(jnp.bfloat16)

    gamma_p = jnp.pad(gamma.astype(jnp.float32), (0, c_pad - cout)).reshape(1, c_pad)
    beta_p = jnp.pad(beta.astype(jnp.float32), (0, c_pad - cout)).reshape(1, c_pad)

    # ---- pass 1: conv matmul + per-tile partial BN statistics ----------------
    cost1 = pl.CostEstimate(
        flops=2 * m_pad * k_pad * c_pad,
        transcendentals=0,
        bytes_accessed=(m_pad * k_pad * 2 + k_pad * c_pad * 2
                        + m_pad * c_pad * 2 + 2 * n_tiles * c_pad * 4),
    )
    y, part_sum, part_sq = pl.pallas_call(
        _conv_stats_kernel,
        out_shape=(
            jax.ShapeDtypeStruct((m_pad, c_pad), jnp.bfloat16),   # bf16 intermediate
            jax.ShapeDtypeStruct((n_tiles, 1, c_pad), jnp.float32),
            jax.ShapeDtypeStruct((n_tiles, 1, c_pad), jnp.float32),
        ),
        grid_spec=pl.GridSpec(
            grid=(n_tiles,),
            in_specs=[
                pl.BlockSpec((tm, k_pad), lambda i: (i, 0)),
                # Constant block index -> fetched once across the grid.
                pl.BlockSpec((k_pad, c_pad), lambda i: (0, 0)),
            ],
            out_specs=(
                pl.BlockSpec((tm, c_pad), lambda i: (i, 0)),
                pl.BlockSpec((1, 1, c_pad), lambda i: (i, 0, 0)),
                pl.BlockSpec((1, 1, c_pad), lambda i: (i, 0, 0)),
            ),
        ),
        compiler_params=pltpu.CompilerParams(
            dimension_semantics=("parallel",),
            vmem_limit_bytes=_VMEM_LIMIT,
        ),
        cost_estimate=cost1,
    )(patches, w_mat)

    # ---- global BatchNorm statistics (tiny [1, Cp] reduction) ----------------
    # NOTE: E[y^2] - mean^2 in f32 is fine for a stem conv (|mean| << rms); switch
    # to a per-tile (count, mean, M2) Chan/Welford merge if tolerances tighten.
    total = jnp.sum(part_sum, axis=0)                       # [1, Cp]
    total_sq = jnp.sum(part_sq, axis=0)                     # [1, Cp]
    m_f = float(m_rows)                                     # true rows (exclude padding)
    mean = total / m_f
    var = jnp.maximum(total_sq / m_f - mean * mean, 0.0)    # biased variance
    inv_std = lax.rsqrt(var + _BN_EPS)
    scale = gamma_p * inv_std                               # [1, Cp]
    shift = beta_p - mean * scale                           # [1, Cp]

    # ---- pass 2: normalize (+ fused crop & channel-major write when legal) ---
    cost2 = pl.CostEstimate(
        flops=2 * m_pad * c_pad,
        transcendentals=0,
        bytes_accessed=m_pad * c_pad * 2 + m_rows * cout * 4 + 2 * c_pad * 4,
    )
    ty = _pick_pass2_ty(ho, wo, _PASS2_MAX_ROWS)
    if ty is not None:
        n_r = ho // ty
        tm2 = ty * wo
        out_cm = pl.pallas_call(
            _bn_transpose_kernel,
            out_shape=jax.ShapeDtypeStruct((n, cout, ho * wo), jnp.float32),
            grid_spec=pl.GridSpec(
                grid=(n, n_r),
                in_specs=[
                    pl.BlockSpec((tm2, c_pad), lambda b, r: (b * n_r + r, 0)),
                    pl.BlockSpec((1, c_pad), lambda b, r: (0, 0)),
                    pl.BlockSpec((1, c_pad), lambda b, r: (0, 0)),
                ],
                out_specs=pl.BlockSpec((1, cout, tm2), lambda b, r: (b, 0, r)),
            ),
            compiler_params=pltpu.CompilerParams(
                dimension_semantics=("parallel", "parallel"),
                vmem_limit_bytes=_VMEM_LIMIT,
            ),
            cost_estimate=cost2,
        )(y, scale, shift)
        # Contiguous split of the last dim only -> no extra HBM pass.
        return out_cm.reshape(n, cout, ho, wo)

    # Fallback (awkward spatial shapes): generic lane-dense normalize, then let
    # XLA do the crop + NCHW transpose as before.
    out_flat = pl.pallas_call(
        _bn_apply_kernel,
        out_shape=jax.ShapeDtypeStruct((m_pad, c_pad), jnp.float32),
        grid_spec=pl.GridSpec(
            grid=(n_tiles,),
            in_specs=[
                pl.BlockSpec((tm, c_pad), lambda i: (i, 0)),
                pl.BlockSpec((1, c_pad), lambda i: (0, 0)),
                pl.BlockSpec((1, c_pad), lambda i: (0, 0)),
            ],
            out_specs=pl.BlockSpec((tm, c_pad), lambda i: (i, 0)),
        ),
        compiler_params=pltpu.CompilerParams(
            dimension_semantics=("parallel",),
            vmem_limit_bytes=_VMEM_LIMIT,
        ),
        cost_estimate=cost2,
    )(y, scale, shift)
    out = out_flat[:m_rows, :cout].reshape(n, ho, wo, cout)
    return jnp.transpose(out, (0, 3, 1, 2))


def _reference(x_nchw, weight_oihw, gamma, beta):
    """Pure-JAX f32 reference: lax conv + training-mode batch norm."""
    y = lax.conv_general_dilated(
        x_nchw, weight_oihw,
        window_strides=(2, 2), padding=((3, 3), (3, 3)),
        dimension_numbers=("NCHW", "OIHW", "NCHW"),
    )
    mean = jnp.mean(y, axis=(0, 2, 3), keepdims=True)
    var = jnp.mean((y - mean) ** 2, axis=(0, 2, 3), keepdims=True)
    return ((y - mean) * lax.rsqrt(var + _BN_EPS) * gamma.reshape(1, -1, 1, 1)
            + beta.reshape(1, -1, 1, 1))


if __name__ == "__main__":
    key = jax.random.PRNGKey(0)
    k_x, k_w = jax.random.split(key)

    batch, in_channels, hw, start_filts = 2, 4, 32, 32

    x = jax.random.normal(k_x, (batch, in_channels, hw, hw), dtype=jnp.float32)

    # Conv weight [Cout, Cin, 7, 7], kaiming-ish deterministic init; no bias.
    fan_in = in_channels * 7 * 7
    w = jax.random.normal(k_w, (start_filts, in_channels, 7, 7),
                          dtype=jnp.float32) * (2.0 / fan_in) ** 0.5
    # BatchNorm2d default init: gamma = 1, beta = 0.
    gamma = jnp.ones((start_filts,), dtype=jnp.float32)
    beta = jnp.zeros((start_filts,), dtype=jnp.float32)

    # Defaults auto-shrink the M tile so this small problem still runs with 2
    # M-tiles (exercising the cross-tile global BN statistics) and takes the
    # fused crop+transpose pass-2 path (Ho=Wo=16 -> ty=16, tm2=256).
    out = start_conv_7x7(x, w, gamma, beta)
    out = jax.block_until_ready(out)

    ref = _reference(x, w, gamma, beta)
    assert out.shape == (batch, start_filts, hw // 2, hw // 2), out.shape
    # bf16 MXU operands + bf16 intermediate (f32 accumulation & statistics)
    # -> tolerance looser than pure f32.
    assert jnp.allclose(out, ref, atol=5e-2, rtol=5e-2), \
        float(jnp.max(jnp.abs(out - ref)))

    print("KERNEL_OK")
</pallas_src>

<mosaic_0001>
module attributes {stable_mosaic.version = 11 : i64} {
  func.func @_conv_stats_kernel(%arg0: i32, %arg1: memref<256x256xbf16, #tpu.memory_space<vmem>>, %arg2: memref<256x128xbf16, #tpu.memory_space<vmem>>, %arg3: memref<256x128xbf16, #tpu.memory_space<vmem>>, %arg4: memref<1x1x128xf32, #tpu.memory_space<vmem>>, %arg5: memref<1x1x128xf32, #tpu.memory_space<vmem>>) attributes {dimension_semantics = [#tpu.dimension_semantics<parallel>], iteration_bounds = array<i64: 2>, scalar_prefetch = 0 : i64, scratch_operands = 0 : i64, tpu.core_type = #tpu.core_type<tc>, window_params = [{transform_indices = @transform_0, window_bounds = array<i64: 256, 256>}, {pipeline_mode = #tpu.pipeline_mode<synchronous>, transform_indices = @transform_1, window_bounds = array<i64: 256, 128>}, {transform_indices = @transform_2, window_bounds = array<i64: 256, 128>}, {transform_indices = @transform_3, window_bounds = array<i64: 1, 1, 128>}, {transform_indices = @transform_4, window_bounds = array<i64: 1, 1, 128>}]} {
    %c0 = arith.constant 0 : index
    %c0_0 = arith.constant 0 : index
    %0 = vector.load %arg1[%c0, %c0_0] : memref<256x256xbf16, #tpu.memory_space<vmem>>, vector<256x256xbf16>
    %c0_1 = arith.constant 0 : index
    %c0_2 = arith.constant 0 : index
    %1 = vector.load %arg2[%c0_1, %c0_2] : memref<256x128xbf16, #tpu.memory_space<vmem>>, vector<256x128xbf16>
    %cst = arith.constant dense<0.000000e+00> : vector<256x128xf32>
    %2 = tpu.matmul %0, %1, %cst {dimension_numbers = #tpu.dot_dimension_numbers<[1], [0], [0], [1], [0, 0, 1, 1], [], []>} : vector<256x256xbf16>, vector<256x128xbf16>, vector<256x128xf32> -> vector<256x128xf32>
    %3 = arith.truncf %2 : vector<256x128xf32> to vector<256x128xbf16>
    %c0_3 = arith.constant 0 : index
    %c0_4 = arith.constant 0 : index
    %4 = vector.load %arg3[%c0_3, %c0_4] : memref<256x128xbf16, #tpu.memory_space<vmem>>, vector<256x128xbf16>
    tpu.vector_store %arg3[%c0_3, %c0_4], %3 {strides = array<i32>} : memref<256x128xbf16, #tpu.memory_space<vmem>>, vector<256x128xbf16>,
    %cst_5 = arith.constant dense<0.000000e+00> : vector<128xf32>
    %5 = vector.multi_reduction <add>, %2, %cst_5 [0] : vector<256x128xf32> to vector<128xf32>
    %6 = vector.shape_cast %5 : vector<128xf32> to vector<1x128xf32>
    %7 = vector.shape_cast %6 : vector<1x128xf32> to vector<1x1x128xf32>
    %c0_6 = arith.constant 0 : index
    %c0_7 = arith.constant 0 : index
    %c0_8 = arith.constant 0 : index
    %8 = vector.load %arg4[%c0_6, %c0_7, %c0_8] : memref<1x1x128xf32, #tpu.memory_space<vmem>>, vector<1x1x128xf32>
    tpu.vector_store %arg4[%c0_6, %c0_7, %c0_8], %7 {strides = array<i32>} : memref<1x1x128xf32, #tpu.memory_space<vmem>>, vector<1x1x128xf32>,
    %9 = arith.mulf %2, %2 : vector<256x128xf32>
    %cst_9 = arith.constant dense<0.000000e+00> : vector<128xf32>
    %10 = vector.multi_reduction <add>, %9, %cst_9 [0] : vector<256x128xf32> to vector<128xf32>
    %11 = vector.shape_cast %10 : vector<128xf32> to vector<1x128xf32>
    %12 = vector.shape_cast %11 : vector<1x128xf32> to vector<1x1x128xf32>
    %c0_10 = arith.constant 0 : index
    %c0_11 = arith.constant 0 : index
    %c0_12 = arith.constant 0 : index
    %13 = vector.load %arg5[%c0_10, %c0_11, %c0_12] : memref<1x1x128xf32, #tpu.memory_space<vmem>>, vector<1x1x128xf32>
    tpu.vector_store %arg5[%c0_10, %c0_11, %c0_12], %12 {strides = array<i32>} : memref<1x1x128xf32, #tpu.memory_space<vmem>>, vector<1x1x128xf32>,
    return
  }
  func.func @transform_0(%arg0: i32) -> (i32, i32) {
    %c0_i32 = arith.constant 0 : i32
    %c0_i32_0 = arith.constant 0 : i32
    return %arg0, %c0_i32 : i32, i32
  }
  func.func @transform_1(%arg0: i32) -> (i32, i32) {
    %c0_i32 = arith.constant 0 : i32
    %c0_i32_0 = arith.constant 0 : i32
    %c0_i32_1 = arith.constant 0 : i32
    return %c0_i32, %c0_i32_0 : i32, i32
  }
  func.func @transform_2(%arg0: i32) -> (i32, i32) {
    %c0_i32 = arith.constant 0 : i32
    %c0_i32_0 = arith.constant 0 : i32
    return %arg0, %c0_i32 : i32, i32
  }
  func.func @transform_3(%arg0: i32) -> (i32, i32, i32) {
    %c0_i32 = arith.constant 0 : i32
    %c0_i32_0 = arith.constant 0 : i32
    %c0_i32_1 = arith.constant 0 : i32
    return %arg0, %c0_i32, %c0_i32_0 : i32, i32, i32
  }
  func.func @transform_4(%arg0: i32) -> (i32, i32, i32) {
    %c0_i32 = arith.constant 0 : i32
    %c0_i32_0 = arith.constant 0 : i32
    %c0_i32_1 = arith.constant 0 : i32
    return %arg0, %c0_i32, %c0_i32_0 : i32, i32, i32
  }
}

module attributes {stable_mosaic.version = 11 : i64} {
  func.func @_bn_transpose_kernel(%arg0: i32, %arg1: i32, %arg2: memref<256x128xbf16, #tpu.memory_space<vmem>>, %arg3: memref<1x128xf32, #tpu.memory_space<vmem>>, %arg4: memref<1x128xf32, #tpu.memory_space<vmem>>, %arg5: memref<1x32x256xf32, #tpu.memory_space<vmem>>) attributes {dimension_semantics = [#tpu.dimension_semantics<parallel>, #tpu.dimension_semantics<parallel>], iteration_bounds = array<i64: 2, 1>, scalar_prefetch = 0 : i64, scratch_operands = 0 : i64, tpu.core_type = #tpu.core_type<tc>, window_params = [{transform_indices = @transform_0, window_bounds = array<i64: 256, 128>}, {pipeline_mode = #tpu.pipeline_mode<synchronous>, transform_indices = @transform_1, window_bounds = array<i64: 1, 128>}, {pipeline_mode = #tpu.pipeline_mode<synchronous>, transform_indices = @transform_2, window_bounds = array<i64: 1, 128>}, {transform_indices = @transform_3, window_bounds = array<i64: 1, 32, 256>}]} {
    %c0 = arith.constant 0 : index
    %c0_0 = arith.constant 0 : index
    %0 = vector.load %arg2[%c0, %c0_0] : memref<256x128xbf16, #tpu.memory_space<vmem>>, vector<256x128xbf16>
    %1 = arith.extf %0 : vector<256x128xbf16> to vector<256x128xf32>
    %c0_1 = arith.constant 0 : index
    %c0_2 = arith.constant 0 : index
    %2 = vector.load %arg3[%c0_1, %c0_2] : memref<1x128xf32, #tpu.memory_space<vmem>>, vector<1x128xf32>
    %3 = vector.broadcast %2 : vector<1x128xf32> to vector<256x128xf32>
    %4 = arith.mulf %1, %3 : vector<256x128xf32>
    %c0_3 = arith.constant 0 : index
    %c0_4 = arith.constant 0 : index
    %5 = vector.load %arg4[%c0_3, %c0_4] : memref<1x128xf32, #tpu.memory_space<vmem>>, vector<1x128xf32>
    %6 = vector.broadcast %5 : vector<1x128xf32> to vector<256x128xf32>
    %7 = arith.addf %4, %6 : vector<256x128xf32>
    %8 = tpu.transpose %7, [1, 0] : vector<256x128xf32> -> vector<128x256xf32>
    %9 = vector.extract_strided_slice %8 {offsets = [0, 0], sizes = [32, 256], strides = [1, 1]} : vector<128x256xf32> to vector<32x256xf32>
    %10 = vector.shape_cast %9 : vector<32x256xf32> to vector<1x32x256xf32>
    %c0_5 = arith.constant 0 : index
    %c0_6 = arith.constant 0 : index
    %c0_7 = arith.constant 0 : index
    %11 = vector.load %arg5[%c0_5, %c0_6, %c0_7] : memref<1x32x256xf32, #tpu.memory_space<vmem>>, vector<1x32x256xf32>
    tpu.vector_store %arg5[%c0_5, %c0_6, %c0_7], %10 {strides = array<i32>} : memref<1x32x256xf32, #tpu.memory_space<vmem>>, vector<1x32x256xf32>,
    return
  }
  func.func @transform_0(%arg0: i32, %arg1: i32) -> (i32, i32) {
    %c1_i32 = arith.constant 1 : i32
    %0 = arith.muli %arg0, %c1_i32 : i32
    %1 = arith.addi %0, %arg1 : i32
    %c0_i32 = arith.constant 0 : i32
    %c0_i32_0 = arith.constant 0 : i32
    return %1, %c0_i32 : i32, i32
  }
  func.func @transform_1(%arg0: i32, %arg1: i32) -> (i32, i32) {
    %c0_i32 = arith.constant 0 : i32
    %c0_i32_0 = arith.constant 0 : i32
    %c0_i32_1 = arith.constant 0 : i32
    return %c0_i32, %c0_i32_0 : i32, i32
  }
  func.func @transform_2(%arg0: i32, %arg1: i32) -> (i32, i32) {
    %c0_i32 = arith.constant 0 : i32
    %c0_i32_0 = arith.constant 0 : i32
    %c0_i32_1 = arith.constant 0 : i32
    return %c0_i32, %c0_i32_0 : i32, i32
  }
  func.func @transform_3(%arg0: i32, %arg1: i32) -> (i32, i32, i32) {
    %c0_i32 = arith.constant 0 : i32
    %c0_i32_0 = arith.constant 0 : i32
    return %arg0, %c0_i32, %arg1 : i32, i32, i32
  }
}

</mosaic_0001>

<bundles_post_ra>
// kernel: start_conv_7x7.3
= control target key start
LH: loop header
LB: loop body
LE: loop exit
PB: predicated region body
PF: predicated region fallthrough
CT: control target
= control target key end

     0   :  { %s659_s12 = smov 0   ;;  %s661_s13 = smov 0   ;;  %s789_s0 = inlined_call_operand.vmem [shape: bf16[512,128], index: 0, kind: input, shape index: {}]   ;;  %s790_s1 = inlined_call_operand.vmem [shape: f32[1,128], index: 1, kind: input, shape index: {}]   ;;  %s791_s2 = inlined_call_operand.vmem [shape: f32[1,128], index: 2, kind: input, shape index: {}]   ;;  %s792_s3 = inlined_call_operand.vmem [shape: f32[2,32,256], index: 3, kind: output, shape index: {}]  }
   0x1   :  { %s663_s14 = smov 0  }
   0x2 LB: > { %s25_s15 = sadd.s32 1, %s633_s13  ;;  %p502_p0 = scmp.ge.s32.totalorder %s637_s14, 1  ;;  %s637_s14 = sphi %s663_s14, %s13_s14   ;;  %s633_s13 = sphi %s661_s13, %s794_s13   ;;  %s629_s12 = sphi %s659_s12, %s793_s12  }
   0x3   : > { %p27_p1 = scmp.ge.s32.totalorder %s25_s15, 2  ;;  %p156_p2 = scmp.lt.s32.totalorder %s637_s14, 3 }
   0x5   : > { %s796_s15 = smov (%p27_p1, %s25_s15), 0  ;;  %p157_p3 = pnand %p502_p0, %p156_p2 }
   0x6   : > { %s503_s16 = sshll.u32 (!%p157_p3), %s629_s12, 5  ;;  %v688_v0 = vld [vmem:[%s790_s1] ss:$0 sm:$0xff] (!%p157_p3)  ;;  %p194_p5 = scmp.lt.s32.totalorder (!%p157_p3), %s629_s12, 1 }
   0x7   : > { %160 = sbr.rel (%p157_p3) target bundleno = 167 (0xa7), region = 32  ;;  %p187_p4 = scmp.lt.s32.totalorder (!%p157_p3), %s503_s16, 63  ;;  %v697_v9 = vld [vmem:[%s791_s2] ss:$0 sm:$0xff] (!%p157_p3) }
   0xe   : > { %s798_s16 = smov (!%p187_p4, %s503_s16), 63  ;;  %s800_s12 = smov (!%p194_p5, %s629_s12), 1 }
   0xf   : > { %s504_s17 = sshll.u32 %s798_s16, 2  ;;  %s511_s25 = sshll.u32 %s800_s12, 6 }
  0x10   : > { %s683_s20 = scalar_lea.vmem %s789_s0, %s504_s17  ;;  %s201_s28 = scalar_lea.vmem %s792_s3, %s511_s25 }
  0x11   : > { %v583_v1 = vld [vmem:[%s683_s20 + $0x40] sm:$0xff]   ;;  %v584_v3 = vld [vmem:[%s683_s20 + $0x48] sm:$0xff]   ;;  %v585_v24 = vld [vmem:[%s683_s20 + $0x50] sm:$0xff]  }
  0x12   : > { %v513_v2 = vld [vmem:[%s683_s20] sm:$0xff]   ;;  %v546_v4 = vunpack.c.l.bf16 %v583_v1  ;;  %v547_v6 = vunpack.c.h.bf16 %v583_v1  ;;  %v576_v8 = vld [vmem:[%s683_s20 + $0x8] sm:$0xff]   ;;  %v550_v10 = vunpack.c.l.bf16 %v584_v3  ;;  %v551_v19 = vunpack.c.h.bf16 %v584_v3  ;;  %v577_v25 = vld [vmem:[%s683_s20 + $0x10] sm:$0xff]  }
  0x13   : > { %v514_v5 = vunpack.c.l.bf16 %v513_v2  ;;  %v515_v7 = vunpack.c.h.bf16 %v513_v2  ;;  %v518_v11 = vunpack.c.l.bf16 %v576_v8  ;;  %v519_v20 = vunpack.c.h.bf16 %v576_v8  ;;  %v586_v38 = vld [vmem:[%s683_s20 + $0x58] sm:$0xff]   ;;  %v587_v52 = vld [vmem:[%s683_s20 + $0x60] sm:$0xff]   ;;  %v588_v3 = vld [vmem:[%s683_s20 + $0x68] sm:$0xff]  }
  0x14   : > { %v290_v12 = vmul.f32 %v546_v4, %v688_v0  ;;  %v291_v14 = vmul.f32 %v547_v6, %v688_v0  ;;  %v292_v18 = vmul.f32 %v550_v10, %v688_v0  ;;  %v293_v26 = vmul.f32 %v551_v19, %v688_v0  ;;  %v578_v39 = vld [vmem:[%s683_s20 + $0x18] sm:$0xff]   ;;  %v579_v53 = vld [vmem:[%s683_s20 + $0x20] sm:$0xff]   ;;  %v580_v4 = vld [vmem:[%s683_s20 + $0x28] sm:$0xff]  }
  0x15   : > { %v274_v13 = vmul.f32 %v514_v5, %v688_v0  ;;  %v275_v15 = vmul.f32 %v515_v7, %v688_v0  ;;  %v276_v23 = vmul.f32 %v518_v11, %v688_v0  ;;  %v277_v27 = vmul.f32 %v519_v20, %v688_v0  ;;  %v581_v19 = vld [vmem:[%s683_s20 + $0x30] sm:$0xff]  }
  0x16   : > { %v329_v16 = vadd.f32 %v697_v9, %v290_v12  ;;  %v330_v21 = vadd.f32 %v697_v9, %v291_v14  ;;  %v331_v28 = vadd.f32 %v697_v9, %v292_v18  ;;  %v554_v30 = vunpack.c.l.bf16 %v585_v24  ;;  %v589_v18 = vld [vmem:[%s683_s20 + $0x70] sm:$0xff]  }
  0x17   : > { %v313_v17 = vadd.f32 %v697_v9, %v274_v13  ;;  %v314_v22 = vadd.f32 %v697_v9, %v275_v15  ;;  %v315_v29 = vadd.f32 %v697_v9, %v276_v23  ;;  %v522_v31 = vunpack.c.l.bf16 %v577_v25 }
  0x18   : > { %377 = vxpose.xlu1.b32.start [1/16] (narrow) %v329_v16, 32  ;;  %v332_v32 = vadd.f32 %v697_v9, %v293_v26  ;;  %v555_v33 = vunpack.c.h.bf16 %v585_v24  ;;  %v316_v34 = vadd.f32 %v697_v9, %v277_v27  ;;  %v294_v35 = vmul.f32 %v554_v30, %v688_v0 }
  0x19   : > { %345 = vxpose.xlu0.b32.start [1/16] (narrow) %v313_v17, 32  ;;  %v278_v36 = vmul.f32 %v522_v31, %v688_v0  ;;  %v523_v37 = vunpack.c.h.bf16 %v577_v25  ;;  %v558_v41 = vunpack.c.l.bf16 %v586_v38  ;;  %v526_v45 = vunpack.c.l.bf16 %v578_v39 }
  0x1a   : > { %v295_v40 = vmul.f32 %v555_v33, %v688_v0  ;;  %v333_v42 = vadd.f32 %v697_v9, %v294_v35  ;;  %v559_v47 = vunpack.c.h.bf16 %v586_v38  ;;  %v527_v51 = vunpack.c.h.bf16 %v578_v39  ;;  %v582_v33 = vld [vmem:[%s683_s20 + $0x38] sm:$0xff]  }
  0x1b   : > { %v317_v43 = vadd.f32 %v697_v9, %v278_v36  ;;  %v279_v44 = vmul.f32 %v523_v37, %v688_v0  ;;  %v296_v46 = vmul.f32 %v558_v41, %v688_v0  ;;  %v280_v50 = vmul.f32 %v526_v45, %v688_v0 }
  0x1c   : > { %378 = vxpose.xlu1.b32.cont [2/16] (narrow) %v330_v21, 32  ;;  %v334_v48 = vadd.f32 %v697_v9, %v295_v40  ;;  %v297_v54 = vmul.f32 %v559_v47, %v688_v0  ;;  %v562_v55 = vunpack.c.l.bf16 %v587_v52  ;;  %v281_v58 = vmul.f32 %v527_v51, %v688_v0 }
  0x1d   : > { %346 = vxpose.xlu0.b32.cont [2/16] (narrow) %v314_v22, 32  ;;  %v318_v49 = vadd.f32 %v697_v9, %v279_v44  ;;  %v335_v56 = vadd.f32 %v697_v9, %v296_v46  ;;  %v319_v57 = vadd.f32 %v697_v9, %v280_v50  ;;  %v530_v59 = vunpack.c.l.bf16 %v579_v53 }
  0x1e   : > { %v336_v60 = vadd.f32 %v697_v9, %v297_v54  ;;  %v298_v61 = vmul.f32 %v562_v55, %v688_v0  ;;  %v320_v62 = vadd.f32 %v697_v9, %v281_v58  ;;  %v563_v1 = vunpack.c.h.bf16 %v587_v52 }
  0x1f   : > { %v282_v63 = vmul.f32 %v530_v59, %v688_v0  ;;  %v531_v2 = vunpack.c.h.bf16 %v579_v53  ;;  %v566_v6 = vunpack.c.l.bf16 %v588_v3  ;;  %v534_v11 = vunpack.c.l.bf16 %v580_v4 }
  0x20   : > { %379 = vxpose.xlu1.b32.cont [3/16] (narrow) %v331_v28, 32  ;;  %v337_v5 = vadd.f32 %v697_v9, %v298_v61  ;;  %v299_v8 = vmul.f32 %v563_v1, %v688_v0  ;;  %v567_v13 = vunpack.c.h.bf16 %v588_v3  ;;  %v535_v17 = vunpack.c.h.bf16 %v580_v4 }
  0x21   : > { %347 = vxpose.xlu0.b32.cont [3/16] (narrow) %v315_v29, 32  ;;  %v321_v7 = vadd.f32 %v697_v9, %v282_v63  ;;  %v283_v10 = vmul.f32 %v531_v2, %v688_v0  ;;  %v300_v12 = vmul.f32 %v566_v6, %v688_v0  ;;  %v284_v16 = vmul.f32 %v534_v11, %v688_v0 }
  0x22   : > { %v338_v14 = vadd.f32 %v697_v9, %v299_v8  ;;  %v301_v20 = vmul.f32 %v567_v13, %v688_v0  ;;  %v570_v21 = vunpack.c.l.bf16 %v589_v18  ;;  %v285_v24 = vmul.f32 %v535_v17, %v688_v0 }
  0x23   : > { %v322_v15 = vadd.f32 %v697_v9, %v283_v10  ;;  %v339_v22 = vadd.f32 %v697_v9, %v300_v12  ;;  %v323_v23 = vadd.f32 %v697_v9, %v284_v16  ;;  %v538_v25 = vunpack.c.l.bf16 %v581_v19 }
  0x24   : > { %380 = vxpose.xlu1.b32.cont [4/16] (narrow) %v332_v32, 32  ;;  %v340_v26 = vadd.f32 %v697_v9, %v301_v20  ;;  %v302_v27 = vmul.f32 %v570_v21, %v688_v0  ;;  %v324_v28 = vadd.f32 %v697_v9, %v285_v24  ;;  %v571_v30 = vunpack.c.h.bf16 %v589_v18  ;;  %v590_v32 = vld [vmem:[%s683_s20 + $0x78] sm:$0xff]  }
  0x25   : > { %348 = vxpose.xlu0.b32.cont [4/16] (narrow) %v316_v34, 32  ;;  %v286_v29 = vmul.f32 %v538_v25, %v688_v0  ;;  %v539_v31 = vunpack.c.h.bf16 %v581_v19  ;;  %v574_v35 = vunpack.c.l.bf16 %v590_v32  ;;  %v542_v39 = vunpack.c.l.bf16 %v582_v33 }
  0x26   : > { %v341_v34 = vadd.f32 %v697_v9, %v302_v27  ;;  %v303_v37 = vmul.f32 %v571_v30, %v688_v0  ;;  %v575_v41 = vunpack.c.h.bf16 %v590_v32  ;;  %v543_v45 = vunpack.c.h.bf16 %v582_v33 }
  0x27   : > { %v325_v36 = vadd.f32 %v697_v9, %v286_v29  ;;  %v287_v38 = vmul.f32 %v539_v31, %v688_v0  ;;  %v304_v40 = vmul.f32 %v574_v35, %v688_v0  ;;  %v288_v44 = vmul.f32 %v542_v39, %v688_v0 }
  0x28   : > { %381 = vxpose.xlu1.b32.cont [5/16] (narrow) %v333_v42, 32  ;;  %v342_v42 = vadd.f32 %v697_v9, %v303_v37  ;;  %v305_v46 = vmul.f32 %v575_v41, %v688_v0 }
  0x29   : > { %349 = vxpose.xlu0.b32.cont [5/16] (narrow) %v317_v43, 32  ;;  %v326_v43 = vadd.f32 %v697_v9, %v287_v38  ;;  %v343_v47 = vadd.f32 %v697_v9, %v304_v40 }
  0x2a   : > { %v344_v50 = vadd.f32 %v697_v9, %v305_v46 }
  0x2c   : > { %382 = vxpose.xlu1.b32.cont [6/16] (narrow) %v334_v48, 32  ;;  %v327_v48 = vadd.f32 %v697_v9, %v288_v44 }
  0x2d   : > { %350 = vxpose.xlu0.b32.cont [6/16] (narrow) %v318_v49, 32  ;;  %v289_v49 = vmul.f32 %v543_v45, %v688_v0 }
  0x2f   : > { %v328_v51 = vadd.f32 %v697_v9, %v289_v49 }
  0x30   : > { %383 = vxpose.xlu1.b32.cont [7/16] (narrow) %v335_v56, 32 }
  0x31   : > { %351 = vxpose.xlu0.b32.cont [7/16] (narrow) %v319_v57, 32 }
  0x34   : > { %384 = vxpose.xlu1.b32.cont [8/16] (narrow) %v336_v60, 32 }
  0x35   : > { %352 = vxpose.xlu0.b32.cont [8/16] (narrow) %v320_v62, 32 }
  0x38   : > { %385 = vxpose.xlu1.b32.cont [9/16] (narrow) %v337_v5, 32 }
  0x39   : > { %353 = vxpose.xlu0.b32.cont [9/16] (narrow) %v321_v7, 32 }
  0x3c   : > { %386 = vxpose.xlu1.b32.cont [10/16] (narrow) %v338_v14, 32 }
  0x3d   : > { %354 = vxpose.xlu0.b32.cont [10/16] (narrow) %v322_v15, 32 }
  0x40   : > { %387 = vxpose.xlu1.b32.cont [11/16] (narrow) %v339_v22, 32 }
  0x41   : > { %355 = vxpose.xlu0.b32.cont [11/16] (narrow) %v323_v23, 32 }
  0x44   : > { %388 = vxpose.xlu1.b32.cont [12/16] (narrow) %v340_v26, 32 }
  0x45   : > { %356 = vxpose.xlu0.b32.cont [12/16] (narrow) %v324_v28, 32 }
  0x48   : > { %389 = vxpose.xlu1.b32.cont [13/16] (narrow) %v341_v34, 32 }
  0x49   : > { %357 = vxpose.xlu0.b32.cont [13/16] (narrow) %v325_v36, 32 }
  0x4c   : > { %390 = vxpose.xlu1.b32.cont [14/16] (narrow) %v342_v42, 32 }
  0x4d   : > { %358 = vxpose.xlu0.b32.cont [14/16] (narrow) %v326_v43, 32 }
  0x50   : > { %391 = vxpose.xlu1.b32.cont [15/16] (narrow) %v343_v47, 32 }
  0x51   : > { %359 = vxpose.xlu0.b32.cont [15/16] (narrow) %v327_v48, 32 }
  0x54   : > { %392 = vxpose.xlu1.b32.end [16/16] (narrow) %v344_v50, 32 }
  0x55   : > { %360 = vxpose.xlu0.b32.end [16/16] (narrow) %v328_v51, 32 }
  0x98   : > { %v393_v52 = vpop.trf.xlu1 }
  0x99   : > { %v361_v53 = vpop.trf.xlu0  ;;  %410 = vst [vmem:[%s201_s28 + $0x8] sm:$0xff] %v393_v52 }
  0x9a   : > { %409 = vst [vmem:[%s201_s28] sm:$0xff] %v361_v53 }
  0x9c   : > { %v394_v0 = vpop.trf.xlu1 }
  0x9d   : > { %v362_v54 = vpop.trf.xlu0  ;;  %412 = vst [vmem:[%s201_s28 + $0x18] sm:$0xff] %v394_v0 }
  0x9e   : > { %411 = vst [vmem:[%s201_s28 + $0x10] sm:$0xff] %v362_v54 }
  0xa0   : > { %v395_v55 = vpop.trf.xlu1 }
  0xa1   : > { %v363_v56 = vpop.trf.xlu0  ;;  %414 = vst [vmem:[%s201_s28 + $0x28] sm:$0xff] %v395_v55 }
  0xa2   : > { %413 = vst [vmem:[%s201_s28 + $0x20] sm:$0xff] %v363_v56 }
  0xa4   : > { %v396_v9 = vpop.trf.xlu1 }
  0xa5   : > { %v364_v57 = vpop.trf.xlu0  ;;  %416 = vst [vmem:[%s201_s28 + $0x38] sm:$0xff] %v396_v9 }
  0xa6   : > { %415 = vst [vmem:[%s201_s28 + $0x30] sm:$0xff] %v364_v57 }
  0xa7 PF: > { %s13_s14 = sadd.s32 1, %s637_s14   ;;  %s793_s12 = smov %s633_s13 }
  0xa8   : > { %p10_p6 = scmp.ge.s32.totalorder %s13_s14, 4   ;;  %s794_s13 = smov %s796_s15 }
  0xaa   :  { %12 = sbr.rel (!%p10_p6) target bundleno = 2 (0x2), region = 62 }

// kernel: start_conv_7x7.2
= control target key start
LH: loop header
LB: loop body
LE: loop exit
PB: predicated region body
PF: predicated region fallthrough
CT: control target
= control target key end

     0   :  { %s1530_s15 = smov 0   ;;  %s1746_s0 = inlined_call_operand.vmem [shape: bf16[512,256], index: 0, kind: input, shape index: {}]   ;;  %s1747_s1 = inlined_call_operand.vmem [shape: bf16[256,128], index: 1, kind: input, shape index: {}]   ;;  %s1748_s2 = inlined_call_operand.vmem [shape: bf16[512,128], index: 2, kind: output, shape index: {0}]   ;;  %s1749_s3 = inlined_call_operand.vmem [shape: f32[2,1,128], index: 3, kind: output, shape index: {1}]   ;;  %s1750_s4 = inlined_call_operand.vmem [shape: f32[2,1,128], index: 4, kind: output, shape index: {2}]  }
   0x1 LB: > { %s1536_s16 = sadd.s32 4294967295, %s1503_s15   ;;  %p1081_p0 = scmp.ge.s32.totalorder %s1503_s15, 1  ;;  %s1503_s15 = sphi %s1530_s15, %s15_s15  }
   0x2   : > { %p169_p1 = scmp.lt.s32.totalorder %s1503_s15, 3 }
   0x4   : > { %p170_p2 = pnand %p1081_p0, %p169_p1 }
   0x5   : > { %v1433_v0 = vld [vmem:[%s1747_s1 + $0x40] sm:$0xff] (!%p170_p2)   ;;  %s1082_s19 = sshll.u32 (!%p170_p2), %s1536_s16, 5  ;;  %v1435_v2 = vld [vmem:[%s1747_s1 + $0x48] sm:$0xff] (!%p170_p2)   ;;  %v1437_v4 = vld [vmem:[%s1747_s1 + $0x50] sm:$0xff] (!%p170_p2)   ;;  %p215_p4 = scmp.lt.s32.totalorder (!%p170_p2), %s1536_s16, 1 }
   0x6   : > { %173 = sbr.rel (%p170_p2) target bundleno = 360 (0x168), region = 28  ;;  %v1434_v1 = vld [vmem:[%s1747_s1] sm:$0xff] (!%p170_p2)   ;;  %1297 = vmatprep.subr.bf16.mxu0 (!%p170_p2), %v1433_v0  ;;  %1409 = vmatprep.subr.bf16.mxu1 (!%p170_p2), %v1433_v0  ;;  %v1436_v3 = vld [vmem:[%s1747_s1 + $0x8] sm:$0xff] (!%p170_p2)   ;;  %p203_p3 = scmp.lt.s32.totalorder (!%p170_p2), %s1082_s19, 63  ;;  %v1438_v5 = vld [vmem:[%s1747_s1 + $0x10] sm:$0xff] (!%p170_p2)  }
   0x7   : > { %1298 = vmatpush3.bf16.msra.mxu0 (!%p170_p2), %v1434_v1  ;;  %1417 = vmatpush3.bf16.msra.mxu1 (!%p170_p2), %v1434_v1  ;;  %v1439_v6 = vld [vmem:[%s1747_s1 + $0x58] sm:$0xff] (!%p170_p2)   ;;  %v1441_v8 = vld [vmem:[%s1747_s1 + $0x60] sm:$0xff] (!%p170_p2)   ;;  %v1443_v10 = vld [vmem:[%s1747_s1 + $0x68] sm:$0xff] (!%p170_p2)  }
   0x8   : > { %1299 = vmatprep.subr.bf16.mxu0 (!%p170_p2), %v1435_v2  ;;  %1410 = vmatprep.subr.bf16.mxu1 (!%p170_p2), %v1435_v2  ;;  %v1440_v7 = vld [vmem:[%s1747_s1 + $0x18] sm:$0xff] (!%p170_p2)   ;;  %v1442_v9 = vld [vmem:[%s1747_s1 + $0x20] sm:$0xff] (!%p170_p2)   ;;  %v1444_v12 = vld [vmem:[%s1747_s1 + $0x28] sm:$0xff] (!%p170_p2)  }
   0x9   : > { %v1445_v13 = vld [vmem:[%s1747_s1 + $0x70] sm:$0xff] (!%p170_p2)   ;;  %v1447_v16 = vld [vmem:[%s1747_s1 + $0x78] sm:$0xff] (!%p170_p2)  }
   0xa   : > { %v1446_v15 = vld [vmem:[%s1747_s1 + $0x30] sm:$0xff] (!%p170_p2)   ;;  %v1448_v17 = vld [vmem:[%s1747_s1 + $0x38] sm:$0xff] (!%p170_p2)  }
   0xb   : > { %1300 = vmatpush3.bf16.msra.mxu0 (!%p170_p2), %v1436_v3  ;;  %1418 = vmatpush3.bf16.msra.mxu1 (!%p170_p2), %v1436_v3 }
   0xc   : > { %1301 = vmatprep.subr.bf16.mxu0 (!%p170_p2), %v1437_v4  ;;  %1411 = vmatprep.subr.bf16.mxu1 (!%p170_p2), %v1437_v4 }
   0xd   : > { %s1752_s19 = smov (!%p203_p3, %s1082_s19), 63  ;;  %s1754_s16 = smov (!%p215_p4, %s1536_s16), 1 }
   0xe   : > { %s1169_s8 = sshll.u32 %s1752_s19, 3  ;;  %s1086_s5 = sshll.u32 %s1752_s19, 2 }
   0xf   : > { %1302 = vmatpush3.bf16.msra.mxu0 %v1438_v5  ;;  %1419 = vmatpush3.bf16.msra.mxu1 %v1438_v5  ;;  %s1574_s13 = scalar_lea.vmem %s1746_s0, %s1169_s8  ;;  %s1635_s8 = scalar_lea.vmem %s1748_s2, %s1086_s5 }
  0x10   : > { %1303 = vmatprep.subr.bf16.mxu0 %v1439_v6  ;;  %1412 = vmatprep.subr.bf16.mxu1 %v1439_v6  ;;  %v1451_v11 = vld [vmem:[%s1574_s13 + $0x4] ss:$8 sps:$4 sm:$0xff]   ;;  %v1449_v18 = vld [vmem:[%s1574_s13] ss:$8 sps:$4 sm:$0xff]   ;;  %v1452_v19 = vld [vmem:[%s1574_s13 + $0x14] ss:$8 sps:$4 sm:$0xff]   ;;  %s217_s10 = scalar_lea.vmem %s1749_s3, %s1754_s16 }
  0x11   : > { %574 = vmatprep.mubr.bf16.mxu0 %v1451_v11  ;;  %v1463_v14 = vld [vmem:[%s1574_s13 + $0x84] ss:$8 sps:$4 sm:$0xff]   ;;  %v1461_v20 = vld [vmem:[%s1574_s13 + $0x80] ss:$8 sps:$4 sm:$0xff]   ;;  %v1467_v21 = vld [vmem:[%s1574_s13 + $0x94] ss:$8 sps:$4 sm:$0xff]  }
  0x12   : > { %638 = vmatprep.mubr.bf16.mxu1 %v1463_v14  ;;  %v1454_v22 = vld [vmem:[%s1574_s13 + $0x10] ss:$8 sps:$4 sm:$0xff]   ;;  %v1455_v23 = vld [vmem:[%s1574_s13 + $0x24] ss:$8 sps:$4 sm:$0xff]   ;;  %v1457_v26 = vld [vmem:[%s1574_s13 + $0x20] ss:$8 sps:$4 sm:$0xff]  }
  0x13   : > { %1304 = vmatpush3.bf16.msra.mxu0 %v1440_v7  ;;  %1420 = vmatpush3.bf16.msra.mxu1 %v1440_v7  ;;  %v1469_v24 = vld [vmem:[%s1574_s13 + $0x90] ss:$8 sps:$4 sm:$0xff]   ;;  %v1473_v25 = vld [vmem:[%s1574_s13 + $0xa4] ss:$8 sps:$4 sm:$0xff]   ;;  %v1458_v27 = vld [vmem:[%s1574_s13 + $0x34] ss:$8 sps:$4 sm:$0xff]  }
  0x14   : > { %1305 = vmatprep.subr.bf16.mxu0 %v1441_v8  ;;  %1413 = vmatprep.subr.bf16.mxu1 %v1441_v8  ;;  %v1475_v28 = vld [vmem:[%s1574_s13 + $0xa0] ss:$8 sps:$4 sm:$0xff]   ;;  %v1479_v29 = vld [vmem:[%s1574_s13 + $0xb4] ss:$8 sps:$4 sm:$0xff]   ;;  %v1460_v30 = vld [vmem:[%s1574_s13 + $0x30] ss:$8 sps:$4 sm:$0xff]  }
  0x15   : > { %v1464_v31 = vld [vmem:[%s1574_s13 + $0x44] ss:$8 sps:$4 sm:$0xff]   ;;  %v1481_v32 = vld [vmem:[%s1574_s13 + $0xb0] ss:$8 sps:$4 sm:$0xff]   ;;  %v1466_v34 = vld [vmem:[%s1574_s13 + $0x40] ss:$8 sps:$4 sm:$0xff]  }
  0x16   : > { %v1485_v33 = vld [vmem:[%s1574_s13 + $0xc4] ss:$8 sps:$4 sm:$0xff]   ;;  %v1470_v35 = vld [vmem:[%s1574_s13 + $0x54] ss:$8 sps:$4 sm:$0xff]   ;;  %v1487_v36 = vld [vmem:[%s1574_s13 + $0xc0] ss:$8 sps:$4 sm:$0xff]  }
  0x17   : > { %1306 = vmatpush3.bf16.msra.mxu0 %v1442_v9  ;;  %1421 = vmatpush3.bf16.msra.mxu1 %v1442_v9  ;;  %v1488_v37 = vld [vmem:[%s1574_s13 + $0xd4] ss:$8 sps:$4 sm:$0xff]   ;;  %v1472_v38 = vld [vmem:[%s1574_s13 + $0x50] ss:$8 sps:$4 sm:$0xff]   ;;  %v1476_v39 = vld [vmem:[%s1574_s13 + $0x64] ss:$8 sps:$4 sm:$0xff]  }
  0x18   : > { %1307 = vmatprep.subr.bf16.mxu0 %v1443_v10  ;;  %1414 = vmatprep.subr.bf16.mxu1 %v1443_v10  ;;  %v1490_v40 = vld [vmem:[%s1574_s13 + $0xd0] ss:$8 sps:$4 sm:$0xff]   ;;  %v1491_v41 = vld [vmem:[%s1574_s13 + $0xe4] ss:$8 sps:$4 sm:$0xff]   ;;  %v1478_v42 = vld [vmem:[%s1574_s13 + $0x60] ss:$8 sps:$4 sm:$0xff]  }
  0x19   : > { %v1482_v43 = vld [vmem:[%s1574_s13 + $0x74] ss:$8 sps:$4 sm:$0xff]   ;;  %v1493_v44 = vld [vmem:[%s1574_s13 + $0xe0] ss:$8 sps:$4 sm:$0xff]   ;;  %v1484_v46 = vld [vmem:[%s1574_s13 + $0x70] ss:$8 sps:$4 sm:$0xff]  }
  0x1a   : > { %v1494_v45 = vld [vmem:[%s1574_s13 + $0xf4] ss:$8 sps:$4 sm:$0xff]   ;;  %v1496_v47 = vld [vmem:[%s1574_s13 + $0xf0] ss:$8 sps:$4 sm:$0xff]   ;;  %s220_s13 = scalar_lea.vmem %s1750_s4, %s1754_s16 }
  0x1b   : > { %1308 = vmatpush3.bf16.msra.mxu0 %v1444_v12  ;;  %1422 = vmatpush3.bf16.msra.mxu1 %v1444_v12 }
  0x1c   : > { %1309 = vmatprep.subr.bf16.mxu0 %v1445_v13  ;;  %1415 = vmatprep.subr.bf16.mxu1 %v1445_v13 }
  0x1f   : > { %1310 = vmatpush3.bf16.msra.mxu0 %v1446_v15  ;;  %1423 = vmatpush3.bf16.msra.mxu1 %v1446_v15 }
  0x20   : > { %1311 = vmatprep.subr.bf16.mxu0 %v1447_v16  ;;  %1416 = vmatprep.subr.bf16.mxu1 %v1447_v16 }
  0x23   : > { %1312 = vmatpush3.bf16.msra.mxu0 %v1448_v17  ;;  %1424 = vmatpush3.bf16.msra.mxu1 %v1448_v17 }
  0x26   : > { %575 = vmatmul.mubr.bf16.vlgmr.msra.gmra.mrb[0].mxu0 %v1449_v18  ;;  %639 = vmatmul.mubr.bf16.vlgmr.msra.gmra.mrb[0].mxu1 %v1461_v20 }
  0x27   : > { %582 = vmatprep.mubr.bf16.mxu0 %v1452_v19  ;;  %646 = vmatprep.mubr.bf16.mxu1 %v1467_v21 }
  0x2e   : > { %583 = vmatmul.mubr.bf16.gmra.mrb[4].mxu0 %v1454_v22  ;;  %647 = vmatmul.mubr.bf16.gmra.mrb[4].mxu1 %v1469_v24 }
  0x2f   : > { %590 = vmatprep.mubr.bf16.mxu0 %v1455_v23  ;;  %654 = vmatprep.mubr.bf16.mxu1 %v1473_v25 }
  0x36   : > { %591 = vmatmul.mubr.bf16.gmra.mrb[8].mxu0 %v1457_v26  ;;  %655 = vmatmul.mubr.bf16.gmra.mrb[8].mxu1 %v1475_v28 }
  0x37   : > { %598 = vmatprep.mubr.bf16.mxu0 %v1458_v27  ;;  %662 = vmatprep.mubr.bf16.mxu1 %v1479_v29 }
  0x3e   : > { %599 = vmatmul.mubr.bf16.gmra.mrb[12].mxu0 %v1460_v30  ;;  %663 = vmatmul.mubr.bf16.gmra.mrb[12].mxu1 %v1481_v32 }
  0x3f   : > { %606 = vmatprep.mubr.bf16.mxu0 %v1464_v31  ;;  %670 = vmatprep.mubr.bf16.mxu1 %v1485_v33 }
  0x46   : > { %607 = vmatmul.mubr.bf16.gmra.mrb[16].mxu0 %v1466_v34  ;;  %671 = vmatmul.mubr.bf16.gmra.mrb[16].mxu1 %v1487_v36 }
  0x47   : > { %614 = vmatprep.mubr.bf16.mxu0 %v1470_v35  ;;  %678 = vmatprep.mubr.bf16.mxu1 %v1488_v37 }
  0x4e   : > { %615 = vmatmul.mubr.bf16.gmra.mrb[20].mxu0 %v1472_v38  ;;  %679 = vmatmul.mubr.bf16.gmra.mrb[20].mxu1 %v1490_v40 }
  0x4f   : > { %622 = vmatprep.mubr.bf16.mxu0 %v1476_v39  ;;  %686 = vmatprep.mubr.bf16.mxu1 %v1491_v41 }
  0x56   : > { %623 = vmatmul.mubr.bf16.gmra.mrb[24].mxu0 %v1478_v42  ;;  %687 = vmatmul.mubr.bf16.gmra.mrb[24].mxu1 %v1493_v44 }
  0x57   : > { %630 = vmatprep.mubr.bf16.mxu0 %v1482_v43  ;;  %694 = vmatprep.mubr.bf16.mxu1 %v1494_v45 }
  0x5e   : > { %631 = vmatmul.mubr.bf16.gmra.mrb[28].mxu0 %v1484_v46  ;;  %695 = vmatmul.mubr.bf16.gmra.mrb[28].mxu1 %v1496_v47 }
  0xf9   : > { %v1313_v48 = vpop.f32.mrb[0].mxu0  ;;  %v1361_v50 = vpop.f32.mrb[0].mxu1 }
  0xfa   : > { %v1314_v49 = vpop.f32.mrb[1].mxu0  ;;  %v1362_v53 = vpop.f32.mrb[1].mxu1 }
  0xfb   : > { %v1315_v51 = vadd.f32 %v1314_v49, %v1313_v48  ;;  %v1316_v52 = vpop.f32.mrb[2].mxu0  ;;  %v1630_v55 = vadd.f32 %v1362_v53, %v1361_v50  ;;  %v1364_v56 = vpop.f32.mrb[2].mxu1 }
  0xfc   : > { %v1317_v54 = vpop.f32.mrb[3].mxu0  ;;  %v1365_v58 = vpop.f32.mrb[3].mxu1 }
  0xfd   : > { %v1318_v57 = vadd.f32 %v1317_v54, %v1316_v52  ;;  %v1637_v59 = vadd.f32 %v1365_v58, %v1364_v56  ;;  %v901_v60 = vmul.f32 %v1315_v51, %v1315_v51 }
  0xff   : > { %v1205_v61 = vpack.c.bf16 %v1318_v57, %v1315_v51  ;;  %v863_v62 = vadd.f32 %v1318_v57, %v1315_v51  ;;  %v902_v63 = vmul.f32 %v1318_v57, %v1318_v57  ;;  %v1245_v0 = vpack.c.bf16 %v1637_v59, %v1630_v55 }
 0x101   : > { %1206 = vst [vmem:[%s1635_s8] sm:$0xff] %v1205_v61   ;;  %v933_v1 = vadd.f32 %v902_v63, %v901_v60  ;;  %v1319_v2 = vpop.f32.mrb[4].mxu0  ;;  %1289 = vst [vmem:[%s1635_s8 + $0x40] sm:$0xff] %v1245_v0   ;;  %v1367_v4 = vpop.f32.mrb[4].mxu1 }
 0x102   : > { %v1320_v3 = vpop.f32.mrb[5].mxu0  ;;  %v1368_v7 = vpop.f32.mrb[5].mxu1 }
 0x103   : > { %v1321_v5 = vadd.f32 %v1320_v3, %v1319_v2  ;;  %v1322_v6 = vpop.f32.mrb[6].mxu0  ;;  %v1643_v9 = vadd.f32 %v1368_v7, %v1367_v4  ;;  %v1370_v10 = vpop.f32.mrb[6].mxu1 }
 0x104   : > { %v1323_v8 = vpop.f32.mrb[7].mxu0  ;;  %v1371_v14 = vpop.f32.mrb[7].mxu1 }
 0x105   : > { %v864_v11 = vadd.f32 %v1321_v5, %v863_v62  ;;  %v903_v12 = vmul.f32 %v1321_v5, %v1321_v5  ;;  %v1324_v13 = vadd.f32 %v1323_v8, %v1322_v6  ;;  %v1645_v15 = vadd.f32 %v1371_v14, %v1370_v10 }
 0x107   : > { %v934_v16 = vadd.f32 %v933_v1, %v903_v12  ;;  %v1210_v17 = vpack.c.bf16 %v1324_v13, %v1321_v5  ;;  %v865_v18 = vadd.f32 %v1324_v13, %v864_v11  ;;  %v904_v19 = vmul.f32 %v1324_v13, %v1324_v13 }
 0x108   : > { %v1250_v20 = vpack.c.bf16 %v1645_v15, %v1643_v9 }
 0x109   : > { %1282 = vst [vmem:[%s1635_s8 + $0x8] sm:$0xff] %v1210_v17   ;;  %v935_v21 = vadd.f32 %v934_v16, %v904_v19  ;;  %v1325_v22 = vpop.f32.mrb[8].mxu0  ;;  %v1373_v24 = vpop.f32.mrb[8].mxu1 }
 0x10a   : > { %v1326_v23 = vpop.f32.mrb[9].mxu0  ;;  %1290 = vst [vmem:[%s1635_s8 + $0x48] sm:$0xff] %v1250_v20   ;;  %v1374_v27 = vpop.f32.mrb[9].mxu1 }
 0x10b   : > { %v1327_v25 = vadd.f32 %v1326_v23, %v1325_v22  ;;  %v1328_v26 = vpop.f32.mrb[10].mxu0  ;;  %v1651_v29 = vadd.f32 %v1374_v27, %v1373_v24  ;;  %v1376_v30 = vpop.f32.mrb[10].mxu1 }
 0x10c   : > { %v1329_v28 = vpop.f32.mrb[11].mxu0  ;;  %v1377_v34 = vpop.f32.mrb[11].mxu1 }
 0x10d   : > { %v866_v31 = vadd.f32 %v1327_v25, %v865_v18  ;;  %v905_v32 = vmul.f32 %v1327_v25, %v1327_v25  ;;  %v1330_v33 = vadd.f32 %v1329_v28, %v1328_v26  ;;  %v1653_v35 = vadd.f32 %v1377_v34, %v1376_v30 }
 0x10f   : > { %v936_v36 = vadd.f32 %v935_v21, %v905_v32  ;;  %v1215_v37 = vpack.c.bf16 %v1330_v33, %v1327_v25  ;;  %v867_v38 = vadd.f32 %v1330_v33, %v866_v31  ;;  %v906_v39 = vmul.f32 %v1330_v33, %v1330_v33 }
 0x110   : > { %v1255_v40 = vpack.c.bf16 %v1653_v35, %v1651_v29 }
 0x111   : > { %1283 = vst [vmem:[%s1635_s8 + $0x10] sm:$0xff] %v1215_v37   ;;  %v937_v41 = vadd.f32 %v936_v36, %v906_v39  ;;  %v1331_v42 = vpop.f32.mrb[12].mxu0  ;;  %v1379_v44 = vpop.f32.mrb[12].mxu1 }
 0x112   : > { %v1332_v43 = vpop.f32.mrb[13].mxu0  ;;  %1291 = vst [vmem:[%s1635_s8 + $0x50] sm:$0xff] %v1255_v40   ;;  %v1380_v47 = vpop.f32.mrb[13].mxu1 }
 0x113   : > { %v1333_v45 = vadd.f32 %v1332_v43, %v1331_v42  ;;  %v1334_v46 = vpop.f32.mrb[14].mxu0  ;;  %v1659_v49 = vadd.f32 %v1380_v47, %v1379_v44  ;;  %v1382_v50 = vpop.f32.mrb[14].mxu1 }
 0x114   : > { %v1335_v48 = vpop.f32.mrb[15].mxu0  ;;  %v1383_v54 = vpop.f32.mrb[15].mxu1 }
 0x115   : > { %v868_v51 = vadd.f32 %v1333_v45, %v867_v38  ;;  %v907_v52 = vmul.f32 %v1333_v45, %v1333_v45  ;;  %v1336_v53 = vadd.f32 %v1335_v48, %v1334_v46  ;;  %v1661_v56 = vadd.f32 %v1383_v54, %v1382_v50 }
 0x117   : > { %v938_v57 = vadd.f32 %v937_v41, %v907_v52  ;;  %v1220_v58 = vpack.c.bf16 %v1336_v53, %v1333_v45  ;;  %v869_v60 = vadd.f32 %v1336_v53, %v868_v51  ;;  %v908_v61 = vmul.f32 %v1336_v53, %v1336_v53 }
 0x118   : > { %v1260_v62 = vpack.c.bf16 %v1661_v56, %v1659_v49 }
 0x119   : > { %1284 = vst [vmem:[%s1635_s8 + $0x18] sm:$0xff] %v1220_v58   ;;  %v939_v63 = vadd.f32 %v938_v57, %v908_v61  ;;  %v1337_v0 = vpop.f32.mrb[16].mxu0  ;;  %v1385_v2 = vpop.f32.mrb[16].mxu1 }
 0x11a   : > { %v1338_v1 = vpop.f32.mrb[17].mxu0  ;;  %1292 = vst [vmem:[%s1635_s8 + $0x58] sm:$0xff] %v1260_v62   ;;  %v1386_v5 = vpop.f32.mrb[17].mxu1 }
 0x11b   : > { %v1339_v3 = vadd.f32 %v1338_v1, %v1337_v0  ;;  %v1340_v4 = vpop.f32.mrb[18].mxu0  ;;  %v1667_v7 = vadd.f32 %v1386_v5, %v1385_v2  ;;  %v1388_v8 = vpop.f32.mrb[18].mxu1 }
 0x11c   : > { %v1341_v6 = vpop.f32.mrb[19].mxu0  ;;  %v1389_v13 = vpop.f32.mrb[19].mxu1 }
 0x11d   : > { %v870_v10 = vadd.f32 %v1339_v3, %v869_v60  ;;  %v909_v11 = vmul.f32 %v1339_v3, %v1339_v3  ;;  %v1342_v12 = vadd.f32 %v1341_v6, %v1340_v4  ;;  %v1669_v14 = vadd.f32 %v1389_v13, %v1388_v8 }
 0x11f   : > { %v940_v16 = vadd.f32 %v939_v63, %v909_v11  ;;  %v1225_v17 = vpack.c.bf16 %v1342_v12, %v1339_v3  ;;  %v871_v18 = vadd.f32 %v1342_v12, %v870_v10  ;;  %v910_v19 = vmul.f32 %v1342_v12, %v1342_v12 }
 0x120   : > { %v1265_v20 = vpack.c.bf16 %v1669_v14, %v1667_v7 }
 0x121   : > { %1285 = vst [vmem:[%s1635_s8 + $0x20] sm:$0xff] %v1225_v17   ;;  %v941_v21 = vadd.f32 %v940_v16, %v910_v19  ;;  %v1343_v22 = vpop.f32.mrb[20].mxu0  ;;  %v1391_v24 = vpop.f32.mrb[20].mxu1 }
 0x122   : > { %v1344_v23 = vpop.f32.mrb[21].mxu0  ;;  %1293 = vst [vmem:[%s1635_s8 + $0x60] sm:$0xff] %v1265_v20   ;;  %v1392_v27 = vpop.f32.mrb[21].mxu1 }
 0x123   : > { %v1345_v25 = vadd.f32 %v1344_v23, %v1343_v22  ;;  %v1346_v26 = vpop.f32.mrb[22].mxu0  ;;  %v1675_v30 = vadd.f32 %v1392_v27, %v1391_v24  ;;  %v1394_v31 = vpop.f32.mrb[22].mxu1  ;;  %v917_v27 = vmul.f32 %v1630_v55, %v1630_v55 }
 0x124   : > { %v1347_v28 = vpop.f32.mrb[23].mxu0  ;;  %v1395_v36 = vpop.f32.mrb[23].mxu1 }
 0x125   : > { %v872_v32 = vadd.f32 %v1345_v25, %v871_v18  ;;  %v911_v33 = vmul.f32 %v1345_v25, %v1345_v25  ;;  %v1348_v34 = vadd.f32 %v1347_v28, %v1346_v26  ;;  %v1677_v37 = vadd.f32 %v1395_v36, %v1394_v31 }
 0x126   : > { %v919_v36 = vmul.f32 %v1643_v9, %v1643_v9 }
 0x127   : > { %v942_v38 = vadd.f32 %v941_v21, %v911_v33  ;;  %v1230_v39 = vpack.c.bf16 %v1348_v34, %v1345_v25  ;;  %v873_v40 = vadd.f32 %v1348_v34, %v872_v32  ;;  %v912_v41 = vmul.f32 %v1348_v34, %v1348_v34 }
 0x128   : > { %v1270_v42 = vpack.c.bf16 %v1677_v37, %v1675_v30  ;;  %v918_v32 = vmul.f32 %v1637_v59, %v1637_v59 }
 0x129   : > { %1286 = vst [vmem:[%s1635_s8 + $0x28] sm:$0xff] %v1230_v39   ;;  %v943_v43 = vadd.f32 %v942_v38, %v912_v41  ;;  %v1349_v44 = vpop.f32.mrb[24].mxu0  ;;  %v1397_v46 = vpop.f32.mrb[24].mxu1 }
 0x12a   : > { %v1350_v45 = vpop.f32.mrb[25].mxu0  ;;  %1294 = vst [vmem:[%s1635_s8 + $0x68] sm:$0xff] %v1270_v42   ;;  %v1398_v50 = vpop.f32.mrb[25].mxu1  ;;  %v921_v42 = vmul.f32 %v1651_v29, %v1651_v29 }
 0x12b   : > { %v1351_v47 = vadd.f32 %v1350_v45, %v1349_v44  ;;  %v1352_v48 = vpop.f32.mrb[26].mxu0  ;;  %v1683_v52 = vadd.f32 %v1398_v50, %v1397_v46  ;;  %v1400_v53 = vpop.f32.mrb[26].mxu1 }
 0x12c   : > { %v1353_v51 = vpop.f32.mrb[27].mxu0  ;;  %v1401_v60 = vpop.f32.mrb[27].mxu1 }
 0x12d   : > { %v874_v54 = vadd.f32 %v1351_v47, %v873_v40  ;;  %v913_v57 = vmul.f32 %v1351_v47, %v1351_v47  ;;  %v1354_v58 = vadd.f32 %v1353_v51, %v1352_v48  ;;  %v1685_v61 = vadd.f32 %v1401_v60, %v1400_v53 }
 0x12e   : > { %v920_v40 = vmul.f32 %v1645_v15, %v1645_v15  ;;  %v925_v53 = vmul.f32 %v1667_v7, %v1667_v7 }
 0x12f   : > { %v944_v62 = vadd.f32 %v943_v43, %v913_v57  ;;  %v1235_v63 = vpack.c.bf16 %v1354_v58, %v1351_v47  ;;  %v875_v0 = vadd.f32 %v1354_v58, %v874_v54  ;;  %v914_v1 = vmul.f32 %v1354_v58, %v1354_v58 }
 0x130   : > { %v1275_v2 = vpack.c.bf16 %v1685_v61, %v1683_v52  ;;  %v926_v58 = vmul.f32 %v1669_v14, %v1669_v14 }
 0x131   : > { %1287 = vst [vmem:[%s1635_s8 + $0x30] sm:$0xff] %v1235_v63   ;;  %v945_v3 = vadd.f32 %v944_v62, %v914_v1  ;;  %v1355_v4 = vpop.f32.mrb[28].mxu0  ;;  %v1403_v6 = vpop.f32.mrb[28].mxu1  ;;  %v927_v62 = vmul.f32 %v1675_v30, %v1675_v30 }
 0x132   : > { %v1356_v5 = vpop.f32.mrb[29].mxu0  ;;  %1295 = vst [vmem:[%s1635_s8 + $0x70] sm:$0xff] %v1275_v2   ;;  %v1404_v11 = vpop.f32.mrb[29].mxu1  ;;  %v929_v2 = vmul.f32 %v1683_v52, %v1683_v52 }
 0x133   : > { %v1357_v8 = vadd.f32 %v1356_v5, %v1355_v4  ;;  %v1358_v10 = vpop.f32.mrb[30].mxu0  ;;  %v1405_v13 = vadd.f32 %v1404_v11, %v1403_v6  ;;  %v1406_v16 = vpop.f32.mrb[30].mxu1 }
 0x134   : > { %v1359_v12 = vpop.f32.mrb[31].mxu0  ;;  %v1407_v20 = vpop.f32.mrb[31].mxu1 }
 0x135   : > { %v876_v17 = vadd.f32 %v1357_v8, %v875_v0  ;;  %v915_v18 = vmul.f32 %v1357_v8, %v1357_v8  ;;  %v1360_v19 = vadd.f32 %v1359_v12, %v1358_v10  ;;  %v1408_v21 = vadd.f32 %v1407_v20, %v1406_v16 }
 0x136   : > { %v931_v4 = vmul.f32 %v1405_v13, %v1405_v13 }
 0x137   : > { %v946_v22 = vadd.f32 %v945_v3, %v915_v18  ;;  %v1240_v23 = vpack.c.bf16 %v1360_v19, %v1357_v8  ;;  %v877_v24 = vadd.f32 %v1360_v19, %v876_v17  ;;  %v916_v25 = vmul.f32 %v1360_v19, %v1360_v19 }
 0x138   : > { %v1280_v26 = vpack.c.bf16 %v1408_v21, %v1405_v13  ;;  %v932_v11 = vmul.f32 %v1408_v21, %v1408_v21 }
 0x139   : > { %1288 = vst [vmem:[%s1635_s8 + $0x38] sm:$0xff] %v1240_v23   ;;  %v878_v28 = vadd.f32 %v1630_v55, %v877_v24  ;;  %v947_v31 = vadd.f32 %v946_v22, %v916_v25 }
 0x13a   : > { %1296 = vst [vmem:[%s1635_s8 + $0x78] sm:$0xff] %v1280_v26  }
 0x13b   : > { %v879_v33 = vadd.f32 %v1637_v59, %v878_v28  ;;  %v948_v34 = vadd.f32 %v947_v31, %v917_v27  ;;  %v922_v59 = vmul.f32 %v1653_v35, %v1653_v35 }
 0x13d   : > { %v880_v38 = vadd.f32 %v1643_v9, %v879_v33  ;;  %v949_v39 = vadd.f32 %v948_v34, %v918_v32  ;;  %v923_v9 = vmul.f32 %v1659_v49, %v1659_v49 }
 0x13f   : > { %v881_v41 = vadd.f32 %v1645_v15, %v880_v38  ;;  %v950_v55 = vadd.f32 %v949_v39, %v919_v36  ;;  %v924_v15 = vmul.f32 %v1661_v56, %v1661_v56 }
 0x141   : > { %v951_v43 = vadd.f32 %v950_v55, %v920_v40  ;;  %v882_v44 = vadd.f32 %v1651_v29, %v881_v41 }
 0x143   : > { %v883_v45 = vadd.f32 %v1653_v35, %v882_v44  ;;  %v952_v46 = vadd.f32 %v951_v43, %v921_v42 }
 0x145   : > { %v884_v47 = vadd.f32 %v1659_v49, %v883_v45  ;;  %v953_v48 = vadd.f32 %v952_v46, %v922_v59 }
 0x147   : > { %v885_v50 = vadd.f32 %v1661_v56, %v884_v47  ;;  %v954_v51 = vadd.f32 %v953_v48, %v923_v9 }
 0x149   : > { %v886_v29 = vadd.f32 %v1667_v7, %v885_v50  ;;  %v955_v54 = vadd.f32 %v954_v51, %v924_v15  ;;  %v928_v7 = vmul.f32 %v1677_v37, %v1677_v37 }
 0x14b   : > { %v956_v35 = vadd.f32 %v955_v54, %v925_v53  ;;  %v887_v57 = vadd.f32 %v1669_v14, %v886_v29 }
 0x14d   : > { %v957_v49 = vadd.f32 %v956_v35, %v926_v58  ;;  %v888_v60 = vadd.f32 %v1675_v30, %v887_v57  ;;  %v930_v30 = vmul.f32 %v1685_v61, %v1685_v61 }
 0x14f   : > { %v958_v56 = vadd.f32 %v957_v49, %v927_v62  ;;  %v889_v63 = vadd.f32 %v1677_v37, %v888_v60 }
 0x151   : > { %v959_v0 = vadd.f32 %v958_v56, %v928_v7  ;;  %v890_v1 = vadd.f32 %v1683_v52, %v889_v63 }
 0x153   : > { %v960_v14 = vadd.f32 %v959_v0, %v929_v2  ;;  %v891_v3 = vadd.f32 %v1685_v61, %v890_v1 }
 0x155   : > { %v961_v5 = vadd.f32 %v960_v14, %v930_v30  ;;  %v892_v6 = vadd.f32 %v1405_v13, %v891_v3 }
 0x157   : > { %v962_v8 = vadd.f32 %v961_v5, %v931_v4  ;;  %v893_v10 = vadd.f32 %v1408_v21, %v892_v6 }
 0x159   : > { %v894_v37 = vrot.slane %v893_v10, 4  ;;  %v963_v12 = vadd.f32 %v962_v8, %v932_v11 }
 0x15b   : > { %v895_v16 = vadd.f32 %v894_v37, %v893_v10  ;;  %v964_v17 = vrot.slane %v963_v12, 4 }
 0x15d   : > { %v896_v18 = vrot.slane %v895_v16, 2  ;;  %v965_v52 = vadd.f32 %v964_v17, %v963_v12 }
 0x15f   : > { %v897_v19 = vadd.f32 %v896_v18, %v895_v16  ;;  %v966_v20 = vrot.slane %v965_v52, 2 }
 0x161   : > { %v898_v22 = vrot.slane %v897_v19, 1  ;;  %v967_v23 = vadd.f32 %v966_v20, %v965_v52 }
 0x163   : > { %v899_v61 = vadd.f32 %v898_v22, %v897_v19  ;;  %v968_v13 = vrot.slane %v967_v23, 1 }
 0x165   : > { %900 = vst [vmem:[%s217_s10] sm:$0x1] %v899_v61  ;;  %v969_v21 = vadd.f32 %v968_v13, %v967_v23 }
 0x167   : > { %970 = vst [vmem:[%s220_s13] sm:$0x1] %v969_v21 }
 0x168 PF: > { %s15_s15 = sadd.s32 1, %s1503_s15  }
 0x169   : > { %p12_p5 = scmp.ge.s32.totalorder %s15_s15, 4  }
 0x16b   :  { %14 = sbr.rel (!%p12_p5) target bundleno = 1 (0x1), region = 82 }

</bundles_post_ra>
